<compile_context>
chip_gen: v7x
topology: tpu7x:2x2x1
jax: 0.10.0
libtpu: 0.0.40
codegen_flags: <defaults>
</compile_context>

<pallas_src>
import functools

import jax
import jax.numpy as jnp
from jax.experimental import pallas as pl
from jax.experimental.pallas import tpu as pltpu


def _round_up(a, b):
    return (a + b - 1) // b * b


def _spgat_scatter_kernel(alpha, nheads, nhid,
                          edge_m_ref, edge_src_ref, a2_ref, out_ref, acc_ref):
    """Attention weighting + node scatter for one (node-tile, edge-tile) cell.

    edge_m_ref  : (E_TILE, H*nhid)   f32  per-edge projected features, all heads
    edge_src_ref: (1, E_TILE)        i32  scatter-target node per edge (-1 = pad)
    a2_ref      : (1, H*nhid)        f32  per-head `a_2` vectors, flattened
    out_ref     : (N_TILE, H*nhid)   f32  lane-dense concat-of-heads output
    acc_ref     : (N_TILE, 2*H*nhid) f32  scratch: [weighted sums | rowsums]
    """
    hn = nheads * nhid
    et = edge_m_ref.shape[0]
    nt = out_ref.shape[0]
    n_idx = pl.program_id(0)
    e_idx = pl.program_id(1)

    @pl.when(e_idx == 0)
    def _init():
        acc_ref[...] = jnp.zeros_like(acc_ref)

    edge_m = edge_m_ref[...]                      # (Et, H*nhid) f32
    a2 = a2_ref[...]                              # (1,  H*nhid) f32

    # Per-head attention coefficient edge_e = exp(-leaky_relu(edge_m . a2)).
    # Computed on VPU/XLU/EUP (no MXU); exp is only evaluated on (Et, H) values.
    # TODO(synk): nn.Dropout on edge_e / the output is identity in eval mode;
    # not applied.
    e_cols = []
    for h in range(nheads):
        m_h = edge_m[:, h * nhid:(h + 1) * nhid]             # (Et, nhid)
        a2_h = a2[:, h * nhid:(h + 1) * nhid]                 # (1, nhid)
        score = jnp.sum(m_h * a2_h, axis=1, keepdims=True)    # (Et, 1)
        power = -jnp.where(score > 0, score, alpha * score)   # -leaky_relu
        e_h = jnp.exp(power)                                  # (Et, 1)
        e_cols.append(jnp.broadcast_to(e_h, (et, nhid)))
    e_cols = jnp.concatenate(e_cols, axis=1)                  # (Et, H*nhid)

    # Fused scatter payload: [edge_e * edge_m | edge_e (repeated per head)].
    payload = jnp.concatenate([edge_m * e_cols, e_cols],
                              axis=1).astype(jnp.bfloat16)    # (Et, 2*H*nhid)

    # One-hot scatter restricted to this node tile (bf16 operands, f32 accum).
    src = edge_src_ref[...]                                   # (1, Et) i32
    node_ids = n_idx * nt + jax.lax.broadcasted_iota(jnp.int32, (nt, et), 0)
    onehot = (node_ids == src).astype(jnp.bfloat16)           # (Nt, Et)

    acc_ref[...] += jnp.dot(onehot, payload,
                            preferred_element_type=jnp.float32)

    @pl.when(e_idx == pl.num_programs(1) - 1)
    def _finalize():
        acc = acc_ref[...]
        h_prime = acc[:, :hn]
        rowsum = acc[:, hn:]
        rowsum = jnp.where(rowsum == 0.0, 1e-12, rowsum)
        h_prime = h_prime / rowsum
        # concat=True in every head of SpGAT.attentions -> ELU activation.
        out_ref[...] = jnp.where(h_prime > 0, h_prime,
                                 jnp.exp(h_prime) - 1.0).astype(out_ref.dtype)


def spgat_forward(x, edge_list, edge_embed, A, A2, alpha, *,
                  e_tile=None, n_tile=None):
    """SpGAT.forward (eval mode): concat of nheads SpGraphAttentionLayer outputs.

    x:          (N, nfeat) float32
    edge_list:  (2, E) int32   (row 0 = scatter-target node, row 1 = other end)
    edge_embed: (E, relation_dim) float32
    A:          (H, nhid, 2*nfeat + relation_dim)   -- per-head `a`
    A2:         (H, 1, nhid)                        -- per-head `a_2`
    returns:    (N, H * nhid) float32
    """
    N, nfeat = x.shape
    E = edge_list.shape[1]
    H, nhid, Din = A.shape
    hn = H * nhid

    # --- projection: heads batched into one wide matmul; the feature concat is
    #     split so the dense matmuls stay N-scale and edge_h never exists.
    a_flat = A.reshape(hn, Din).astype(jnp.float32)
    a_src = a_flat[:, :nfeat]
    a_dst = a_flat[:, nfeat:2 * nfeat]
    a_rel = a_flat[:, 2 * nfeat:]
    xf = x.astype(jnp.float32)
    p_src = xf @ a_src.T                                      # (N, H*nhid)
    p_dst = xf @ a_dst.T                                      # (N, H*nhid)
    edge_m = (p_src[edge_list[0]] + p_dst[edge_list[1]]
              + edge_embed.astype(jnp.float32) @ a_rel.T)     # (E, H*nhid)

    a2_flat = A2.reshape(1, hn).astype(jnp.float32)

    # --- tiling / padding.  e_tile must be a multiple of 128 (lanes), n_tile a
    #     multiple of 8 (sublanes).  Padded edges scatter into node -1 (no-op);
    #     padded node rows are sliced off below.
    if e_tile is None:
        e_tile = 1024 if E > 1024 else _round_up(E, 128)
    if n_tile is None:
        n_tile = 256 if N > 256 else _round_up(N, 8)
    e_tile = _round_up(e_tile, 128)
    n_tile = _round_up(n_tile, 8)
    e_pad = _round_up(E, e_tile)
    n_pad = _round_up(N, n_tile)

    edge_m_p = jnp.zeros((e_pad, hn), jnp.float32).at[:E].set(edge_m)
    src_p = jnp.full((1, e_pad), -1, jnp.int32).at[0, :E].set(
        edge_list[0].astype(jnp.int32))

    out = pl.pallas_call(
        functools.partial(_spgat_scatter_kernel, float(alpha), H, nhid),
        out_shape=jax.ShapeDtypeStruct((n_pad, hn), jnp.float32),
        grid_spec=pltpu.PrefetchScalarGridSpec(
            num_scalar_prefetch=0,
            grid=(n_pad // n_tile, e_pad // e_tile),
            in_specs=[
                pl.BlockSpec((e_tile, hn), lambda n, e: (e, 0)),   # edge features
                pl.BlockSpec((1, e_tile), lambda n, e: (0, e)),    # src ids (lanes)
                pl.BlockSpec((1, hn), lambda n, e: (0, 0)),        # a_2 (all heads)
            ],
            out_specs=pl.BlockSpec((n_tile, hn), lambda n, e: (n, 0)),
            scratch_shapes=[pltpu.VMEM((n_tile, 2 * hn), jnp.float32)],
        ),
        compiler_params=pltpu.CompilerParams(
            dimension_semantics=("parallel", "arbitrary")),
    )(edge_m_p, src_p, a2_flat)

    # `out` is already the torch.cat(dim=1) column layout; SpGAT's dropout_layer
    # is identity at inference.
    return out[:N]


def spgat_reference(x, edge_list, edge_embed, A, A2, alpha):
    """Plain-JAX reference mirroring the PyTorch math (eval mode)."""
    N = x.shape[0]
    H, nhid, _ = A.shape
    edge_h = jnp.concatenate([x[edge_list[0]], x[edge_list[1]], edge_embed], axis=1)
    src = edge_list[0]
    outs = []
    for h in range(H):
        edge_m = edge_h @ A[h].T                                   # (E, nhid)
        score = edge_m @ A2[h].T                                   # (E, 1)
        power = -jnp.where(score > 0, score, alpha * score)
        edge_e = jnp.exp(power)                                    # (E, 1)
        rowsum = jax.ops.segment_sum(edge_e, src, num_segments=N)  # (N, 1)
        rowsum = jnp.where(rowsum == 0.0, 1e-12, rowsum)
        hp = jax.ops.segment_sum(edge_e * edge_m, src, num_segments=N) / rowsum
        outs.append(jnp.where(hp > 0, hp, jnp.exp(hp) - 1.0))
    return jnp.concatenate(outs, axis=1)


if __name__ == "__main__":
    # Small, deterministic configuration consistent with SpGAT.__init__.
    num_nodes = 48      # N
    nfeat = 8           # entity input embedding dim
    nhid = 8            # entity output embedding dim per head
    relation_dim = 8
    nheads = 2
    alpha = 0.2
    num_edges = 300
    Din = 2 * nfeat + relation_dim

    key = jax.random.PRNGKey(0)
    k_x, k_rel, k_e0, k_e1, k_a, k_a2 = jax.random.split(key, 6)

    entity_embeddings = jax.random.normal(k_x, (num_nodes, nfeat), jnp.float32)
    edge_embed = jax.random.normal(k_rel, (num_edges, relation_dim), jnp.float32)
    edge_list = jnp.stack([
        jax.random.randint(k_e0, (num_edges,), 0, num_nodes),
        jax.random.randint(k_e1, (num_edges,), 0, num_nodes),
    ]).astype(jnp.int32)

    # Per-head parameters a: (nhid, 2*nfeat + relation_dim), a_2: (1, nhid).
    A = 0.1 * jax.random.normal(k_a, (nheads, nhid, Din), jnp.float32)
    A2 = 0.1 * jax.random.normal(k_a2, (nheads, 1, nhid), jnp.float32)

    # Small explicit tiles so the test exercises multi-tile accumulation over
    # edges, the parallel node-tile axis, and the padding paths.
    out = spgat_forward(entity_embeddings, edge_list, edge_embed, A, A2, alpha,
                        e_tile=128, n_tile=32)
    out = jax.block_until_ready(out)
    assert out.shape == (num_nodes, nheads * nhid)

    ref = spgat_reference(entity_embeddings, edge_list, edge_embed, A, A2, alpha)
    # bf16 MXU operands (one-hot is exact; weighted payload loses ~3 digits),
    # f32 accumulation -> 1e-2 tolerance.
    assert jnp.allclose(out, ref, rtol=1e-2, atol=1e-2), "mismatch vs JAX reference"

    print("KERNEL_OK")
</pallas_src>

<mosaic_0001>
module attributes {stable_mosaic.version = 11 : i64} {
  func.func @_spgat_scatter_kernel(%arg0: i32, %arg1: i32, %arg2: memref<128x16xf32, #tpu.memory_space<vmem>>, %arg3: memref<1x128xi32, #tpu.memory_space<vmem>>, %arg4: memref<1x16xf32, #tpu.memory_space<vmem>>, %arg5: memref<32x16xf32, #tpu.memory_space<vmem>>, %arg6: memref<32x32xf32, #tpu.memory_space<vmem>>) attributes {dimension_semantics = [#tpu.dimension_semantics<parallel>, #tpu.dimension_semantics<arbitrary>], iteration_bounds = array<i64: 2, 3>, scalar_prefetch = 0 : i64, scratch_operands = 1 : i64, tpu.core_type = #tpu.core_type<tc>, window_params = [{transform_indices = @transform_0, window_bounds = array<i64: 128, 16>}, {transform_indices = @transform_1, window_bounds = array<i64: 1, 128>}, {pipeline_mode = #tpu.pipeline_mode<synchronous>, transform_indices = @transform_2, window_bounds = array<i64: 1, 16>}, {transform_indices = @transform_3, window_bounds = array<i64: 32, 16>}]} {
    %c0_i32 = arith.constant 0 : i32
    %0 = arith.cmpi eq, %arg1, %c0_i32 : i32
    %1 = arith.extui %0 : i1 to i32
    %c0_i32_0 = arith.constant 0 : i32
    %2 = arith.cmpi ne, %1, %c0_i32_0 : i32
    scf.if %2 {
      %cst_19 = arith.constant 0.000000e+00 : f32
      %58 = vector.broadcast %cst_19 : f32 to vector<32x32xf32>
      %c0_20 = arith.constant 0 : index
      %c0_21 = arith.constant 0 : index
      %59 = vector.load %arg6[%c0_20, %c0_21] : memref<32x32xf32, #tpu.memory_space<vmem>>, vector<32x32xf32>
      tpu.vector_store %arg6[%c0_20, %c0_21], %58 {strides = array<i32>} : memref<32x32xf32, #tpu.memory_space<vmem>>, vector<32x32xf32>,
    } else {
    }
    %c0 = arith.constant 0 : index
    %c0_1 = arith.constant 0 : index
    %3 = vector.load %arg2[%c0, %c0_1] : memref<128x16xf32, #tpu.memory_space<vmem>>, vector<128x16xf32>
    %c0_2 = arith.constant 0 : index
    %c0_3 = arith.constant 0 : index
    %4 = vector.load %arg4[%c0_2, %c0_3] : memref<1x16xf32, #tpu.memory_space<vmem>>, vector<1x16xf32>
    %5 = vector.extract_strided_slice %3 {offsets = [0, 0], sizes = [128, 8], strides = [1, 1]} : vector<128x16xf32> to vector<128x8xf32>
    %6 = vector.extract_strided_slice %4 {offsets = [0, 0], sizes = [1, 8], strides = [1, 1]} : vector<1x16xf32> to vector<1x8xf32>
    %7 = vector.broadcast %6 : vector<1x8xf32> to vector<128x8xf32>
    %8 = arith.mulf %5, %7 : vector<128x8xf32>
    %cst = arith.constant dense<0.000000e+00> : vector<128xf32>
    %9 = vector.multi_reduction <add>, %8, %cst [1] : vector<128x8xf32> to vector<128xf32>
    %10 = vector.shape_cast %9 : vector<128xf32> to vector<128x1xf32>
    %cst_4 = arith.constant 0.000000e+00 : f32
    %11 = vector.broadcast %cst_4 : f32 to vector<128x1xf32>
    %12 = arith.cmpf ogt, %10, %11 : vector<128x1xf32>
    %cst_5 = arith.constant 2.000000e-01 : f32
    %13 = vector.broadcast %cst_5 : f32 to vector<128x1xf32>
    %14 = arith.mulf %13, %10 : vector<128x1xf32>
    %15 = arith.select %12, %10, %14 : vector<128x1xi1>, vector<128x1xf32>
    %cst_6 = arith.constant 0.000000e+00 : f32
    %16 = vector.broadcast %cst_6 : f32 to vector<128x1xf32>
    %17 = arith.subf %16, %15 : vector<128x1xf32>
    %18 = math.exp %17 : vector<128x1xf32>
    %19 = vector.shape_cast %18 : vector<128x1xf32> to vector<128x1xf32>
    %20 = vector.broadcast %19 : vector<128x1xf32> to vector<128x8xf32>
    %21 = vector.extract_strided_slice %3 {offsets = [0, 8], sizes = [128, 8], strides = [1, 1]} : vector<128x16xf32> to vector<128x8xf32>
    %22 = vector.extract_strided_slice %4 {offsets = [0, 8], sizes = [1, 8], strides = [1, 1]} : vector<1x16xf32> to vector<1x8xf32>
    %23 = vector.broadcast %22 : vector<1x8xf32> to vector<128x8xf32>
    %24 = arith.mulf %21, %23 : vector<128x8xf32>
    %cst_7 = arith.constant dense<0.000000e+00> : vector<128xf32>
    %25 = vector.multi_reduction <add>, %24, %cst_7 [1] : vector<128x8xf32> to vector<128xf32>
    %26 = vector.shape_cast %25 : vector<128xf32> to vector<128x1xf32>
    %cst_8 = arith.constant 0.000000e+00 : f32
    %27 = vector.broadcast %cst_8 : f32 to vector<128x1xf32>
    %28 = arith.cmpf ogt, %26, %27 : vector<128x1xf32>
    %cst_9 = arith.constant 2.000000e-01 : f32
    %29 = vector.broadcast %cst_9 : f32 to vector<128x1xf32>
    %30 = arith.mulf %29, %26 : vector<128x1xf32>
    %31 = arith.select %28, %26, %30 : vector<128x1xi1>, vector<128x1xf32>
    %cst_10 = arith.constant 0.000000e+00 : f32
    %32 = vector.broadcast %cst_10 : f32 to vector<128x1xf32>
    %33 = arith.subf %32, %31 : vector<128x1xf32>
    %34 = math.exp %33 : vector<128x1xf32>
    %35 = vector.shape_cast %34 : vector<128x1xf32> to vector<128x1xf32>
    %36 = vector.broadcast %35 : vector<128x1xf32> to vector<128x8xf32>
    %37 = tpu.concatenate %20, %36 in 1 : vector<128x8xf32>, vector<128x8xf32> -> vector<128x16xf32>
    %38 = arith.mulf %3, %37 : vector<128x16xf32>
    %39 = tpu.concatenate %38, %37 in 1 : vector<128x16xf32>, vector<128x16xf32> -> vector<128x32xf32>
    %40 = arith.truncf %39 : vector<128x32xf32> to vector<128x32xbf16>
    %c0_11 = arith.constant 0 : index
    %c0_12 = arith.constant 0 : index
    %41 = vector.load %arg3[%c0_11, %c0_12] : memref<1x128xi32, #tpu.memory_space<vmem>>, vector<1x128xi32>
    %c32_i32 = arith.constant 32 : i32
    %42 = arith.muli %arg0, %c32_i32 : i32
    %43 = tpu.iota {dimensions = array<i32: 0>} : vector<32x128xi32>
    %44 = vector.broadcast %42 : i32 to vector<32x128xi32>
    %45 = arith.addi %44, %43 : vector<32x128xi32>
    %46 = vector.broadcast %41 : vector<1x128xi32> to vector<32x128xi32>
    %47 = arith.cmpi eq, %45, %46 : vector<32x128xi32>
    %48 = arith.extui %47 : vector<32x128xi1> to vector<32x128xi32>
    %49 = arith.sitofp %48 : vector<32x128xi32> to vector<32x128xf32>
    %50 = arith.truncf %49 : vector<32x128xf32> to vector<32x128xbf16>
    %c0_13 = arith.constant 0 : index
    %c0_14 = arith.constant 0 : index
    %51 = vector.load %arg6[%c0_13, %c0_14] : memref<32x32xf32, #tpu.memory_space<vmem>>, vector<32x32xf32>
    %cst_15 = arith.constant dense<0.000000e+00> : vector<32x32xf32>
    %52 = tpu.matmul %50, %40, %cst_15 {dimension_numbers = #tpu.dot_dimension_numbers<[1], [0], [0], [1], [0, 0, 1, 1], [], []>} : vector<32x128xbf16>, vector<128x32xbf16>, vector<32x32xf32> -> vector<32x32xf32>
    %53 = arith.addf %51, %52 : vector<32x32xf32>
    %c0_16 = arith.constant 0 : index
    %c0_17 = arith.constant 0 : index
    %54 = vector.load %arg6[%c0_16, %c0_17] : memref<32x32xf32, #tpu.memory_space<vmem>>, vector<32x32xf32>
    tpu.vector_store %arg6[%c0_16, %c0_17], %53 {strides = array<i32>} : memref<32x32xf32, #tpu.memory_space<vmem>>, vector<32x32xf32>,
    %c2_i32 = arith.constant 2 : i32
    %55 = arith.cmpi eq, %arg1, %c2_i32 : i32
    %56 = arith.extui %55 : i1 to i32
    %c0_i32_18 = arith.constant 0 : i32
    %57 = arith.cmpi ne, %56, %c0_i32_18 : i32
    scf.if %57 {
      %c0_19 = arith.constant 0 : index
      %c0_20 = arith.constant 0 : index
      %58 = vector.load %arg6[%c0_19, %c0_20] : memref<32x32xf32, #tpu.memory_space<vmem>>, vector<32x32xf32>
      %59 = vector.extract_strided_slice %58 {offsets = [0, 0], sizes = [32, 16], strides = [1, 1]} : vector<32x32xf32> to vector<32x16xf32>
      %60 = vector.extract_strided_slice %58 {offsets = [0, 16], sizes = [32, 16], strides = [1, 1]} : vector<32x32xf32> to vector<32x16xf32>
      %cst_21 = arith.constant 0.000000e+00 : f32
      %61 = vector.broadcast %cst_21 : f32 to vector<32x16xf32>
      %62 = arith.cmpf oeq, %60, %61 : vector<32x16xf32>
      %cst_22 = arith.constant 9.99999996E-13 : f32
      %63 = vector.broadcast %cst_22 : f32 to vector<32x16xf32>
      %64 = arith.select %62, %63, %60 : vector<32x16xi1>, vector<32x16xf32>
      %65 = arith.divf %59, %64 : vector<32x16xf32>
      %cst_23 = arith.constant 0.000000e+00 : f32
      %66 = vector.broadcast %cst_23 : f32 to vector<32x16xf32>
      %67 = arith.cmpf ogt, %65, %66 : vector<32x16xf32>
      %68 = math.exp %65 : vector<32x16xf32>
      %cst_24 = arith.constant 1.000000e+00 : f32
      %69 = vector.broadcast %cst_24 : f32 to vector<32x16xf32>
      %70 = arith.subf %68, %69 : vector<32x16xf32>
      %71 = arith.select %67, %65, %70 : vector<32x16xi1>, vector<32x16xf32>
      %c0_25 = arith.constant 0 : index
      %c0_26 = arith.constant 0 : index
      %72 = vector.load %arg5[%c0_25, %c0_26] : memref<32x16xf32, #tpu.memory_space<vmem>>, vector<32x16xf32>
      tpu.vector_store %arg5[%c0_25, %c0_26], %71 {strides = array<i32>} : memref<32x16xf32, #tpu.memory_space<vmem>>, vector<32x16xf32>,
    } else {
    }
    return
  }
  func.func @transform_0(%arg0: i32, %arg1: i32) -> (i32, i32) {
    %c0_i32 = arith.constant 0 : i32
    %c0_i32_0 = arith.constant 0 : i32
    return %arg1, %c0_i32 : i32, i32
  }
  func.func @transform_1(%arg0: i32, %arg1: i32) -> (i32, i32) {
    %c0_i32 = arith.constant 0 : i32
    %c0_i32_0 = arith.constant 0 : i32
    return %c0_i32, %arg1 : i32, i32
  }
  func.func @transform_2(%arg0: i32, %arg1: i32) -> (i32, i32) {
    %c0_i32 = arith.constant 0 : i32
    %c0_i32_0 = arith.constant 0 : i32
    %c0_i32_1 = arith.constant 0 : i32
    return %c0_i32, %c0_i32_0 : i32, i32
  }
  func.func @transform_3(%arg0: i32, %arg1: i32) -> (i32, i32) {
    %c0_i32 = arith.constant 0 : i32
    %c0_i32_0 = arith.constant 0 : i32
    return %arg0, %c0_i32 : i32, i32
  }
}

</mosaic_0001>

<bundles_post_ra>
// kernel: tpu_custom_call.1
= control target key start
LH: loop header
LB: loop body
LE: loop exit
PB: predicated region body
PF: predicated region fallthrough
CT: control target
= control target key end

     0   :  { %s1244_s12 = smov 0   ;;  %s1246_s13 = smov 0   ;;  %s1637_s0 = inlined_call_operand.vmem [shape: f32[384,16], index: 0, kind: input, shape index: {}]   ;;  %s1638_s1 = inlined_call_operand.vmem [shape: s32[1,384], index: 1, kind: input, shape index: {}]   ;;  %s1639_s2 = inlined_call_operand.vmem [shape: f32[1,16], index: 2, kind: input, shape index: {}]   ;;  %s1640_s3 = inlined_call_operand.vmem [shape: f32[64,16], index: 3, kind: output, shape index: {}]  }
   0x1   :  { %s1248_s14 = smov 0   ;;  %s1250_s15 = smov 0  }
   0x2   :  { %s1252_s16 = smov 0  }
   0x3 LB: > { %s22_s17 = sadd.s32 1, %s1209_s14  ;;  %s25_s18 = sadd.s32 1, %s1213_s15  ;;  %s1217_s16 = sphi %s1252_s16, %s13_s16   ;;  %s1213_s15 = sphi %s1250_s15, %s1646_s15   ;;  %s1209_s14 = sphi %s1248_s14, %s1645_s14   ;;  %s1205_s13 = sphi %s1246_s13, %s1644_s13   ;;  %s1201_s12 = sphi %s1244_s12, %s1643_s12  }
   0x4   : > { %p23_p0 = scmp.ge.s32.totalorder %s22_s17, 3  ;;  %p960_p1 = scmp.ge.s32.totalorder %s1217_s16, 1 }
   0x5   : > { %p158_p2 = scmp.lt.s32.totalorder %s1217_s16, 7 }
   0x6   : > { %s1648_s17 = smov (%p23_p0, %s22_s17), 0  ;;  %s1650_s18 = smov (!%p23_p0, %s25_s18), %s1213_s15 }
   0x7   : > { %p159_p3 = pnand %p960_p1, %p158_p2  ;;  %p27_p4 = scmp.ge.s32.totalorder %s1650_s18, 2 }
   0x8   : > { %s961_s19 = sshll.u32 (!%p159_p3), %s1201_s12, 4  ;;  %p191_p5 = scmp.lt.s32.totalorder (!%p159_p3), %s1201_s12, 2 }
   0x9   : > { %s1652_s18 = smov (%p27_p4, %s1650_s18), 0  ;;  %162 = sbr.rel (%p159_p3) target bundleno = 842 (0x34a), region = 32 }
   0xa   : > { %p186_p6 = scmp.lt.s32.totalorder (!%p159_p3), %s961_s19, 47  ;;  %s963_s20 = sshll.u32 (!%p159_p3), %s1205_s13, 2 }
   0xb   : > { %p195_p7 = scmp.lt.s32.totalorder (!%p159_p3), %s963_s20, 7  ;;  %p965_p8 = scmp.ne.s32.totalorder (!%p159_p3), %s1201_s12, 0 }
  0x10   : > { %s1282_s21 = scalar_select %p191_p5, %s1201_s12, 2 }
  0x11   : > { %s1654_s19 = smov (!%p186_p6, %s961_s19), 47  ;;  %s1656_s20 = smov (!%p195_p7, %s963_s20), 7 }
  0x12   : > { %s193_s24 = scalar_lea.vmem %s1638_s1, %s1282_s21  ;;  %s962_s25 = sshll.u32 %s1654_s19, 3  ;;  %vm205_vm0 = vcmask (!%p965_p8), 261120   ;;  %v1219_v0 = vmov (!%p965_p8), 0.0  }
  0x13   : > { %s1291_s28 = scalar_lea.vmem %s1637_s0, %s962_s25  ;;  %s964_s29 = sshll.u32 %s1656_s20, 3  ;;  %206 = vst.msk [vmem:[#allocation2] sm:$0xff] (!%p965_p8), %vm205_vm0, %v1219_v0  ;;  %207 = vst.msk [vmem:[#allocation2 + $0x8] sm:$0xff] (!%p965_p8), %vm205_vm0, %v1219_v0 }
  0x14   : > { %s1296_s5 = scalar_lea.vmem %s1640_s3, %s964_s29  ;;  %204 = sbr.rel (%p965_p8) target bundleno = 27 (0x1b), region = 36  ;;  %208 = vst.msk [vmem:[#allocation2 + $0x10] sm:$0xff] (!%p965_p8), %vm205_vm0, %v1219_v0  ;;  %209 = vst.msk [vmem:[#allocation2 + $0x18] sm:$0xff] (!%p965_p8), %vm205_vm0, %v1219_v0 }
  0x1b PF: > { %v1300_v1 = vld [vmem:[%s1291_s28 + $0x10] sm:$0xff]  ;;  %v966_v2 = vld [vmem:[%s1639_s2] ss:$0 sm:$0xff]  ;;  %v1311_v6 = vld [vmem:[%s1291_s28 + $0x8] sm:$0xff]  ;;  %s1220_s8 = smov 120   ;;  %vm249_vm1 = vcmask 64512  }
  0x1c   : > { %v1306_v3 = vld [vmem:[%s1291_s28] sm:$0xff]  ;;  %v235_v4 = vmul.f32 %v966_v2, %v1300_v1  ;;  %v1314_v7 = vld [vmem:[%s1291_s28 + $0x18] sm:$0xff]  ;;  %v234_v8 = vmul.f32 %v966_v2, %v1311_v6  ;;  %v1324_v11 = vld [vmem:[%s1291_s28 + $0x28] sm:$0xff]  ;;  %s1221_s9 = smov 16   ;;  %s967_s10 = sshll.u32 %s1205_s13, 5 }
  0x1d   : > { %v233_v5 = vmul.f32 %v966_v2, %v1306_v3  ;;  %v236_v9 = vmul.f32 %v966_v2, %v1314_v7  ;;  %v1321_v10 = vld [vmem:[%s1291_s28 + $0x20] sm:$0xff]  ;;  %v238_v13 = vmul.f32 %v966_v2, %v1324_v11  ;;  %v1331_v14 = vld [vmem:[%s1291_s28 + $0x30] sm:$0xff]  ;;  %v1334_v15 = vld [vmem:[%s1291_s28 + $0x38] sm:$0xff]  ;;  %p977_p9 = scmp.ne.s32.totalorder %s1201_s12, 2 }
  0x1e   : > { %414 = vrot.lane.b32.xlu1 %v235_v4, %s1220_s8  ;;  %v237_v12 = vmul.f32 %v966_v2, %v1321_v10  ;;  %v239_v16 = vmul.f32 %v966_v2, %v1331_v14  ;;  %v240_v17 = vmul.f32 %v966_v2, %v1334_v15  ;;  %v1341_v18 = vld [vmem:[%s1291_s28 + $0x40] sm:$0xff]  ;;  %v1344_v19 = vld [vmem:[%s1291_s28 + $0x48] sm:$0xff]  ;;  %v1351_v22 = vld [vmem:[%s1291_s28 + $0x50] sm:$0xff]  ;;  %v253_v36 = vsel %vm249_vm1, %v234_v8, 0.0  ;;  %s1223_s19 = smov (!%p977_p9), 112  }
  0x1f   : > { %410 = vrot.lane.b32.xlu0 %v233_v5, %s1220_s8  ;;  %v241_v20 = vmul.f32 %v966_v2, %v1341_v18  ;;  %v242_v21 = vmul.f32 %v966_v2, %v1344_v19  ;;  %v1354_v23 = vld [vmem:[%s1291_s28 + $0x58] sm:$0xff]  ;;  %v243_v24 = vmul.f32 %v966_v2, %v1351_v22  ;;  %v1361_v26 = vld [vmem:[%s1291_s28 + $0x60] sm:$0xff]  ;;  %v1364_v27 = vld [vmem:[%s1291_s28 + $0x68] sm:$0xff]  ;;  %v250_v34 = vsel %vm249_vm1, %v233_v5, 0.0 }
  0x20   : > { %v244_v25 = vmul.f32 %v966_v2, %v1354_v23  ;;  %v245_v28 = vmul.f32 %v966_v2, %v1361_v26  ;;  %v246_v29 = vmul.f32 %v966_v2, %v1364_v27  ;;  %v1371_v30 = vld [vmem:[%s1291_s28 + $0x70] sm:$0xff]  ;;  %v1374_v31 = vld [vmem:[%s1291_s28 + $0x78] sm:$0xff]  ;;  %v259_v35 = vsel %vm249_vm1, %v236_v9, 0.0 }
  0x21   : > { %v247_v32 = vmul.f32 %v966_v2, %v1371_v30  ;;  %v248_v33 = vmul.f32 %v966_v2, %v1374_v31  ;;  %v265_v37 = vsel %vm249_vm1, %v238_v13, 0.0  ;;  %v256_v38 = vsel %vm249_vm1, %v235_v4, 0.0 }
  0x22   : > { %416 = vrot.lane.b32.xlu1 %v236_v9, %s1220_s8  ;;  %v271_v39 = vsel %vm249_vm1, %v240_v17, 0.0  ;;  %v262_v40 = vsel %vm249_vm1, %v237_v12, 0.0  ;;  %v277_v41 = vsel %vm249_vm1, %v242_v21, 0.0  ;;  %v268_v42 = vsel %vm249_vm1, %v239_v16, 0.0 }
  0x23   : > { %412 = vrot.lane.b32.xlu0 %v234_v8, %s1220_s8  ;;  %v283_v43 = vsel %vm249_vm1, %v244_v25, 0.0  ;;  %v274_v44 = vsel %vm249_vm1, %v241_v20, 0.0  ;;  %v289_v45 = vsel %vm249_vm1, %v246_v29, 0.0  ;;  %v280_v46 = vsel %vm249_vm1, %v243_v24, 0.0 }
  0x24   : > { %v295_v47 = vsel %vm249_vm1, %v248_v33, 0.0  ;;  %v286_v48 = vsel %vm249_vm1, %v245_v28, 0.0  ;;  %v292_v49 = vsel %vm249_vm1, %v247_v32, 0.0 }
  0x26   : > { %420 = vrot.lane.b32.xlu1 %v238_v13, %s1220_s8 }
  0x27   : > { %418 = vrot.lane.b32.xlu0 %v237_v12, %s1220_s8 }
  0x2a   : > { %424 = vrot.lane.b32.xlu1 %v240_v17, %s1220_s8 }
  0x2b   : > { %422 = vrot.lane.b32.xlu0 %v239_v16, %s1220_s8 }
  0x2e   : > { %428 = vrot.lane.b32.xlu1 %v242_v21, %s1220_s8 }
  0x2f   : > { %426 = vrot.lane.b32.xlu0 %v241_v20, %s1220_s8 }
  0x32   : > { %432 = vrot.lane.b32.xlu1 %v244_v25, %s1220_s8 }
  0x33   : > { %430 = vrot.lane.b32.xlu0 %v243_v24, %s1220_s8 }
  0x36   : > { %436 = vrot.lane.b32.xlu1 %v246_v29, %s1220_s8 }
  0x37   : > { %434 = vrot.lane.b32.xlu0 %v245_v28, %s1220_s8 }
  0x3a   : > { %440 = vrot.lane.b32.xlu1 %v248_v33, %s1220_s8 }
  0x3b   : > { %438 = vrot.lane.b32.xlu0 %v247_v32, %s1220_s8 }
  0x5a   : > { %251 = vadd.xlane.f32.xlu0 %v250_v34 }
  0x5e   : > { %260 = vadd.xlane.f32.xlu0 %v259_v35  ;;  %254 = vadd.xlane.f32.xlu1 %v253_v36 }
  0x62   : > { %266 = vadd.xlane.f32.xlu0 %v265_v37  ;;  %257 = vadd.xlane.f32.xlu1 %v256_v38 }
  0x66   : > { %272 = vadd.xlane.f32.xlu0 %v271_v39  ;;  %263 = vadd.xlane.f32.xlu1 %v262_v40 }
  0x6a   : > { %278 = vadd.xlane.f32.xlu0 %v277_v41  ;;  %269 = vadd.xlane.f32.xlu1 %v268_v42 }
  0x6e   : > { %284 = vadd.xlane.f32.xlu0 %v283_v43  ;;  %275 = vadd.xlane.f32.xlu1 %v274_v44 }
  0x72   : > { %290 = vadd.xlane.f32.xlu0 %v289_v45  ;;  %281 = vadd.xlane.f32.xlu1 %v280_v46 }
  0x76   : > { %296 = vadd.xlane.f32.xlu0 %v295_v47  ;;  %287 = vadd.xlane.f32.xlu1 %v286_v48 }
  0x7a   : > { %293 = vadd.xlane.f32.xlu1 %v292_v49 }
  0x90   : > { %v415_v50 = vpop.permute.xlu1 %414 }
  0x91   : > { %v411_v51 = vpop.permute.xlu0 %410  ;;  %v464_v52 = vsel %vm249_vm1, %v415_v50, 0.0 }
  0x92   : > { %v458_v53 = vsel %vm249_vm1, %v411_v51, 0.0  ;;  %465 = vadd.xlane.f32.xlu1 %v464_v52 }
  0x93   : > { %459 = vadd.xlane.f32.xlu0 %v458_v53 }
  0x94   : > { %v417_v55 = vpop.permute.xlu1 %416 }
  0x95   : > { %v413_v54 = vpop.permute.xlu0 %412  ;;  %v467_v57 = vsel %vm249_vm1, %v417_v55, 0.0 }
  0x96   : > { %v461_v56 = vsel %vm249_vm1, %v413_v54, 0.0 }
  0x97   : > { %462 = vadd.xlane.f32.xlu0 %v461_v56 }
  0x98   : > { %v421_v59 = vpop.permute.xlu1 %420 }
  0x99   : > { %v419_v58 = vpop.permute.xlu0 %418  ;;  %v473_v61 = vsel %vm249_vm1, %v421_v59, 0.0 }
  0x9a   : > { %v470_v60 = vsel %vm249_vm1, %v419_v58, 0.0 }
  0x9b   : > { %471 = vadd.xlane.f32.xlu1 %v470_v60  ;;  %468 = vadd.xlane.f32.xlu0 %v467_v57 }
  0x9c   : > { %v425_v63 = vpop.permute.xlu1 %424 }
  0x9d   : > { %v423_v62 = vpop.permute.xlu0 %422  ;;  %v479_v2 = vsel %vm249_vm1, %v425_v63, 0.0 }
  0x9e   : > { %v476_v0 = vsel %vm249_vm1, %v423_v62, 0.0 }
  0x9f   : > { %477 = vadd.xlane.f32.xlu1 %v476_v0  ;;  %474 = vadd.xlane.f32.xlu0 %v473_v61 }
  0xa0   : > { %v429_v5 = vpop.permute.xlu1 %428 }
  0xa1   : > { %v427_v4 = vpop.permute.xlu0 %426  ;;  %v485_v9 = vsel %vm249_vm1, %v429_v5, 0.0 }
  0xa2   : > { %v482_v8 = vsel %vm249_vm1, %v427_v4, 0.0 }
  0xa3   : > { %483 = vadd.xlane.f32.xlu1 %v482_v8  ;;  %480 = vadd.xlane.f32.xlu0 %v479_v2 }
  0xa4   : > { %v433_v13 = vpop.permute.xlu1 %432 }
  0xa5   : > { %v431_v12 = vpop.permute.xlu0 %430  ;;  %v491_v17 = vsel %vm249_vm1, %v433_v13, 0.0 }
  0xa6   : > { %v488_v16 = vsel %vm249_vm1, %v431_v12, 0.0 }
  0xa7   : > { %489 = vadd.xlane.f32.xlu1 %v488_v16  ;;  %486 = vadd.xlane.f32.xlu0 %v485_v9 }
  0xa8   : > { %v437_v21 = vpop.permute.xlu1 %436 }
  0xa9   : > { %v435_v20 = vpop.permute.xlu0 %434  ;;  %v497_v25 = vsel %vm249_vm1, %v437_v21, 0.0 }
  0xaa   : > { %v494_v24 = vsel %vm249_vm1, %v435_v20, 0.0 }
  0xab   : > { %495 = vadd.xlane.f32.xlu1 %v494_v24  ;;  %492 = vadd.xlane.f32.xlu0 %v491_v17 }
  0xac   : > { %v441_v29 = vpop.permute.xlu1 %440 }
  0xad   : > { %v439_v28 = vpop.permute.xlu0 %438  ;;  %v503_v33 = vsel %vm249_vm1, %v441_v29, 0.0 }
  0xae   : > { %v500_v32 = vsel %vm249_vm1, %v439_v28, 0.0 }
  0xaf   : > { %501 = vadd.xlane.f32.xlu1 %v500_v32  ;;  %498 = vadd.xlane.f32.xlu0 %v497_v25 }
  0xb3   : > { %504 = vadd.xlane.f32.xlu0 %v503_v33 }
  0xe7   : > { %v252_v35 = vpop.xlane.xlu0 %251 }
  0xe8   : > { %v314_v44 = vmul.f32 0.2, %v252_v35  ;;  %vm298_vm2 = vcmp.gt.f32.partialorder %v252_v35, 0.0 }
  0xea   : > { %v330_v48 = vsel %vm298_vm2, %v252_v35, %v314_v44 }
  0xeb   : > { %v255_v34 = vpop.xlane.xlu1 %254  ;;  %v261_v37 = vpop.xlane.xlu0 %260  ;;  %v346_v52 = vsub.f32 0.0, %v330_v48 }
  0xec   : > { %v317_v45 = vmul.f32 0.2, %v261_v37  ;;  %v315_v47 = vmul.f32 0.2, %v255_v34  ;;  %vm301_vm3 = vcmp.gt.f32.partialorder %v261_v37, 0.0  ;;  %vm299_vm4 = vcmp.gt.f32.partialorder %v255_v34, 0.0 }
  0xed   : > { %v362_v63 = vmul.f32 1.442695, %v346_v52 }
  0xee   : > { %v333_v51 = vsel %vm301_vm3, %v261_v37, %v317_v45  ;;  %v331_v53 = vsel %vm299_vm4, %v255_v34, %v315_v47 }
  0xef   : > { %v258_v36 = vpop.xlane.xlu1 %257  ;;  %v267_v39 = vpop.xlane.xlu0 %266  ;;  %v349_v58 = vsub.f32 0.0, %v333_v51  ;;  %v347_v61 = vsub.f32 0.0, %v331_v53  ;;  %1099 = vpow2.f32 %v362_v63 }
  0xf0   : > { %v319_v50 = vmul.f32 0.2, %v267_v39  ;;  %vm303_vm5 = vcmp.gt.f32.partialorder %v267_v39, 0.0  ;;  %v316_v54 = vmul.f32 0.2, %v258_v36  ;;  %vm300_vm6 = vcmp.gt.f32.partialorder %v258_v36, 0.0 }
  0xf1   : > { %v368_v12 = vmul.f32 1.442695, %v349_v58  ;;  %v364_v16 = vmul.f32 1.442695, %v347_v61 }
  0xf2   : > { %v335_v59 = vsel %vm303_vm5, %v267_v39, %v319_v50  ;;  %v332_v0 = vsel %vm300_vm6, %v258_v36, %v316_v54 }
  0xf3   : > { %v264_v38 = vpop.xlane.xlu1 %263  ;;  %v273_v41 = vpop.xlane.xlu0 %272  ;;  %v351_v5 = vsub.f32 0.0, %v335_v59  ;;  %v348_v17 = vsub.f32 0.0, %v332_v0  ;;  %1101 = vpow2.f32 %v368_v12 }
  0xf4   : > { %v321_v55 = vmul.f32 0.2, %v273_v41  ;;  %v318_v56 = vmul.f32 0.2, %v264_v38  ;;  %vm305_vm7 = vcmp.gt.f32.partialorder %v273_v41, 0.0  ;;  %vm302_vm8 = vcmp.gt.f32.partialorder %v264_v38, 0.0 }
  0xf5   : > { %v372_v29 = vmul.f32 1.442695, %v351_v5  ;;  %1103 = vpow2.f32 %v364_v16  ;;  %v366_v35 = vmul.f32 1.442695, %v348_v17 }
  0xf6   : > { %v337_v2 = vsel %vm305_vm7, %v273_v41, %v321_v55  ;;  %v334_v8 = vsel %vm302_vm8, %v264_v38, %v318_v56 }
  0xf7   : > { %v270_v40 = vpop.xlane.xlu1 %269  ;;  %v279_v43 = vpop.xlane.xlu0 %278  ;;  %v353_v20 = vsub.f32 0.0, %v337_v2  ;;  %v350_v24 = vsub.f32 0.0, %v334_v8  ;;  %1105 = vpow2.f32 %v372_v29 }
  0xf8   : > { %v323_v60 = vmul.f32 0.2, %v279_v43  ;;  %vm307_vm9 = vcmp.gt.f32.partialorder %v279_v43, 0.0  ;;  %v320_v4 = vmul.f32 0.2, %v270_v40  ;;  %vm304_vm10 = vcmp.gt.f32.partialorder %v270_v40, 0.0 }
  0xf9   : > { %v376_v36 = vmul.f32 1.442695, %v353_v20  ;;  %v370_v38 = vmul.f32 1.442695, %v350_v24  ;;  %1107 = vpow2.f32 %v366_v35  ;;  %v1424_v58 = vpop.eup %1099 }
  0xfa   : > { %v339_v13 = vsel %vm307_vm9, %v279_v43, %v323_v60  ;;  %v336_v25 = vsel %vm304_vm10, %v270_v40, %v320_v4 }
  0xfb   : > { %v276_v42 = vpop.xlane.xlu1 %275  ;;  %v285_v49 = vpop.xlane.xlu0 %284  ;;  %v355_v32 = vsub.f32 0.0, %v339_v13  ;;  %v352_v37 = vsub.f32 0.0, %v336_v25  ;;  %1109 = vpow2.f32 %v376_v36 }
  0xfc   : > { %v325_v9 = vmul.f32 0.2, %v285_v49  ;;  %vm309_vm11 = vcmp.gt.f32.partialorder %v285_v49, 0.0  ;;  %v322_v28 = vmul.f32 0.2, %v276_v42  ;;  %vm306_vm12 = vcmp.gt.f32.partialorder %v276_v42, 0.0 }
  0xfd   : > { %v380_v44 = vmul.f32 1.442695, %v355_v32  ;;  %v374_v50 = vmul.f32 1.442695, %v352_v37  ;;  %1111 = vpow2.f32 %v370_v38  ;;  %v1427_v2 = vpop.eup %1101 }
  0xfe   : > { %v341_v33 = vsel %vm309_vm11, %v285_v49, %v325_v9  ;;  %v338_v39 = vsel %vm306_vm12, %v276_v42, %v322_v28 }
  0xff   : > { %v1414_v46 = vpop.xlane.xlu1 %281  ;;  %v291_v62 = vpop.xlane.xlu0 %290  ;;  %v357_v41 = vsub.f32 0.0, %v341_v33  ;;  %v354_v51 = vsub.f32 0.0, %v338_v39  ;;  %1113 = vpow2.f32 %v380_v44 }
 0x100   : > { %v327_v43 = vmul.f32 0.2, %v291_v62  ;;  %v324_v40 = vmul.f32 0.2, %v1414_v46  ;;  %vm311_vm13 = vcmp.gt.f32.partialorder %v291_v62, 0.0  ;;  %vm308_vm0 = vcmp.gt.f32.partialorder %v1414_v46, 0.0  ;;  %v1429_v5 = vpop.eup %1103 }
 0x101   : > { %v384_v42 = vmul.f32 1.442695, %v357_v41  ;;  %1115 = vpow2.f32 %v374_v50  ;;  %v378_v61 = vmul.f32 1.442695, %v354_v51  ;;  %v1433_v17 = vpop.eup %1105 }
 0x102   : > { %v343_v52 = vsel %vm311_vm13, %v291_v62, %v327_v43  ;;  %v340_v59 = vsel %vm308_vm0, %v1414_v46, %v324_v40 }
 0x103   : > { %v1416_v57 = vpop.xlane.xlu1 %287  ;;  %v1420_v34 = vpop.xlane.xlu0 %296  ;;  %v359_v63 = vsub.f32 0.0, %v343_v52  ;;  %1117 = vpow2.f32 %v384_v42  ;;  %v356_v8 = vsub.f32 0.0, %v340_v59 }
 0x104   : > { %vm313_vm3 = vcmp.gt.f32.partialorder %v1420_v34, 0.0  ;;  %v329_v9 = vmul.f32 0.2, %v1420_v34  ;;  %vm310_vm6 = vcmp.gt.f32.partialorder %v1416_v57, 0.0  ;;  %v326_v28 = vmul.f32 0.2, %v1416_v57  ;;  %v1437_v33 = vpop.eup %1107 }
 0x105   : > { %v388_v20 = vmul.f32 1.442695, %v359_v63  ;;  %v1442_v41 = vpop.eup %1109 }
 0x106   : > { %v345_v35 = vsel %vm313_vm3, %v1420_v34, %v329_v9  ;;  %v342_v42 = vsel %vm310_vm6, %v1416_v57, %v326_v28 }
 0x107   : > { %v1418_v21 = vpop.xlane.xlu1 %293  ;;  %v1444_v40 = vpop.eup %1111  ;;  %v361_v52 = vsub.f32 0.0, %v345_v35 }
 0x108   : > { %vm312_vm11 = vcmp.gt.f32.partialorder %v1418_v21, 0.0 }
 0x11f   : > { %v466_v45 = vpop.xlane.xlu1 %465 }
 0x120   : > { %v460_v47 = vpop.xlane.xlu0 %459  ;;  %vm508_vm14 = vcmp.gt.f32.partialorder %v466_v45, 0.0  ;;  %v524_v48 = vmul.f32 0.2, %v466_v45 }
 0x121   : > { %vm506_vm15 = vcmp.gt.f32.partialorder %v460_v47, 0.0  ;;  %v522_v49 = vmul.f32 0.2, %v460_v47 }
 0x122   : > { %v540_v54 = vsel %vm508_vm14, %v466_v45, %v524_v48  ;;  %v382_v45 = vmul.f32 1.442695, %v356_v8  ;;  %v1446_v48 = vpop.eup %1113 }
 0x123   : > { %v538_v53 = vsel %vm506_vm15, %v460_v47, %v522_v49  ;;  %v556_v62 = vsub.f32 0.0, %v540_v54  ;;  %v1448_v51 = vpop.eup %1115 }
 0x124   : > { %v554_v55 = vsub.f32 0.0, %v538_v53  ;;  %v463_v56 = vpop.xlane.xlu0 %462  ;;  %v1453_v59 = vpop.eup %1117 }
 0x125   : > { %vm507_vm2 = vcmp.gt.f32.partialorder %v463_v56, 0.0  ;;  %v523_v60 = vmul.f32 0.2, %v463_v56  ;;  %v574_v29 = vmul.f32 1.442695, %v556_v62 }
 0x126   : > { %v570_v0 = vmul.f32 1.442695, %v554_v55 }
 0x127   : > { %v539_v4 = vsel %vm507_vm2, %v463_v56, %v523_v60 }
 0x128   : > { %v555_v12 = vsub.f32 0.0, %v539_v4  ;;  %v472_v46 = vpop.xlane.xlu1 %471  ;;  %v469_v13 = vpop.xlane.xlu0 %468  ;;  %1119 = vpow2.f32 %v570_v0  ;;  %v358_v4 = vsub.f32 0.0, %v342_v42 }
 0x129   : > { %vm510_vm4 = vcmp.gt.f32.partialorder %v472_v46, 0.0  ;;  %v526_v16 = vmul.f32 0.2, %v472_v46  ;;  %vm509_vm5 = vcmp.gt.f32.partialorder %v469_v13, 0.0  ;;  %1121 = vpow2.f32 %v378_v61 }
 0x12a   : > { %v572_v24 = vmul.f32 1.442695, %v555_v12  ;;  %v525_v25 = vmul.f32 0.2, %v469_v13  ;;  %v328_v12 = vmul.f32 0.2, %v1418_v21 }
 0x12b   : > { %v542_v32 = vsel %vm510_vm4, %v472_v46, %v526_v16 }
 0x12c   : > { %1123 = vpow2.f32 %v572_v24  ;;  %v558_v36 = vsub.f32 0.0, %v542_v32  ;;  %v541_v37 = vsel %vm509_vm5, %v469_v13, %v525_v25  ;;  %v478_v38 = vpop.xlane.xlu1 %477  ;;  %v475_v39 = vpop.xlane.xlu0 %474 }
 0x12d   : > { %v557_v43 = vsub.f32 0.0, %v541_v37  ;;  %vm512_vm7 = vcmp.gt.f32.partialorder %v478_v38, 0.0  ;;  %v528_v44 = vmul.f32 0.2, %v478_v38  ;;  %vm511_vm8 = vcmp.gt.f32.partialorder %v475_v39, 0.0 }
 0x12e   : > { %1125 = vpow2.f32 %v388_v20  ;;  %v527_v47 = vmul.f32 0.2, %v475_v39  ;;  %v578_v34 = vmul.f32 1.442695, %v558_v36 }
 0x12f   : > { %1127 = vpow2.f32 %v574_v29  ;;  %v576_v49 = vmul.f32 1.442695, %v557_v43  ;;  %v544_v50 = vsel %vm512_vm7, %v478_v38, %v528_v44  ;;  %v392_v43 = vmul.f32 1.442695, %v361_v52 }
 0x130   : > { %v560_v53 = vsub.f32 0.0, %v544_v50  ;;  %v543_v54 = vsel %vm511_vm8, %v475_v39, %v527_v47  ;;  %v484_v55 = vpop.xlane.xlu1 %483  ;;  %v481_v56 = vpop.xlane.xlu0 %480 }
 0x131   : > { %1129 = vpow2.f32 %v576_v49  ;;  %v559_v60 = vsub.f32 0.0, %v543_v54  ;;  %vm514_vm9 = vcmp.gt.f32.partialorder %v484_v55, 0.0  ;;  %v530_v61 = vmul.f32 0.2, %v484_v55 }
 0x132   : > { %1131 = vpow2.f32 %v382_v45  ;;  %v582_v63 = vmul.f32 1.442695, %v560_v53  ;;  %vm513_vm10 = vcmp.gt.f32.partialorder %v481_v56, 0.0  ;;  %v529_v0 = vmul.f32 0.2, %v481_v56  ;;  %v1120_v62 = vpop.eup %1119 }
 0x133   : > { %1133 = vpow2.f32 %v578_v34  ;;  %v580_v8 = vmul.f32 1.442695, %v559_v60  ;;  %v546_v57 = vsel %vm514_vm9, %v484_v55, %v530_v61  ;;  %v1455_v9 = vpop.eup %1121  ;;  %v1461_v32 = vsel %vm249_vm1, %v1424_v58, %v1120_v62 }
 0x134   : > { %v562_v46 = vsub.f32 0.0, %v546_v57  ;;  %v545_v13 = vsel %vm513_vm10, %v481_v56, %v529_v0  ;;  %v490_v16 = vpop.xlane.xlu1 %489  ;;  %v487_v20 = vpop.xlane.xlu0 %486  ;;  %v386_v53 = vmul.f32 1.442695, %v358_v4  ;;  %vm698_vm10 = vcmask 130048  }
 0x135   : > { %1135 = vpow2.f32 %v580_v8  ;;  %v561_v24 = vsub.f32 0.0, %v545_v13  ;;  %vm516_vm12 = vcmp.gt.f32.partialorder %v490_v16, 0.0  ;;  %v532_v25 = vmul.f32 0.2, %v490_v16 }
 0x136   : > { %v1124_v28 = vpop.eup %1123  ;;  %1137 = vpow2.f32 %v582_v63  ;;  %vm515_vm13 = vcmp.gt.f32.partialorder %v487_v20, 0.0  ;;  %v531_v29 = vmul.f32 0.2, %v487_v20  ;;  %v586_v35 = vmul.f32 1.442695, %v562_v46 }
 0x137   : > { %v584_v36 = vmul.f32 1.442695, %v561_v24  ;;  %v548_v37 = vsel %vm516_vm12, %v490_v16, %v532_v25  ;;  %v1465_v38 = vsel %vm249_vm1, %v1429_v5, %v1124_v28  ;;  %v344_v5 = vsel %vm312_vm11, %v1418_v21, %v328_v12 }
 0x138   : > { %v1467_v39 = vpop.eup %1125  ;;  %v564_v44 = vsub.f32 0.0, %v548_v37  ;;  %v547_v45 = vsel %vm515_vm13, %v487_v20, %v531_v29  ;;  %v496_v47 = vpop.xlane.xlu1 %495  ;;  %v1059_v49 = vpack.i.bf16 %v1465_v38, %v1461_v32  ;;  %v360_v13 = vsub.f32 0.0, %v344_v5 }
 0x139   : > { %v493_v34 = vpop.xlane.xlu0 %492  ;;  %v1128_v50 = vpop.eup %1127  ;;  %1139 = vpow2.f32 %v584_v36  ;;  %v563_v58 = vsub.f32 0.0, %v547_v45  ;;  %vm518_vm14 = vcmp.gt.f32.partialorder %v496_v47, 0.0  ;;  %v534_v42 = vmul.f32 0.2, %v496_v47 }
 0x13a   : > { %vm517_vm15 = vcmp.gt.f32.partialorder %v493_v34, 0.0  ;;  %v533_v54 = vmul.f32 0.2, %v493_v34  ;;  %1060 = vrot.lane.b32.xlu1 %v1059_v49, %s1221_s9  ;;  %1141 = vpow2.f32 %v586_v35  ;;  %v590_v55 = vmul.f32 1.442695, %v564_v44 }
 0x13b   : > { %v1130_v52 = vpop.eup %1129  ;;  %v588_v56 = vmul.f32 1.442695, %v563_v58  ;;  %v550_v60 = vsel %vm518_vm14, %v496_v47, %v534_v42  ;;  %v1479_v8 = vsel %vm249_vm1, %v1437_v33, %v1128_v50  ;;  %v390_v58 = vmul.f32 1.442695, %v360_v13 }
 0x13c   : > { %v1475_v61 = vpop.eup %1131  ;;  %v566_v63 = vsub.f32 0.0, %v550_v60  ;;  %v549_v0 = vsel %vm517_vm15, %v493_v34, %v533_v54  ;;  %v502_v62 = vpop.xlane.xlu1 %501  ;;  %v1483_v21 = vsel %vm249_vm1, %v1427_v2, %v1130_v52 }
 0x13d   : > { %v499_v4 = vpop.xlane.xlu0 %498  ;;  %v1134_v57 = vpop.eup %1133  ;;  %1143 = vpow2.f32 %v588_v56  ;;  %v565_v12 = vsub.f32 0.0, %v549_v0  ;;  %vm520_vm0 = vcmp.gt.f32.partialorder %v502_v62, 0.0  ;;  %v536_v46 = vmul.f32 0.2, %v502_v62 }
 0x13e   : > { %vm519_vm2 = vcmp.gt.f32.partialorder %v499_v4, 0.0  ;;  %v535_v16 = vmul.f32 0.2, %v499_v4  ;;  %v1064_v20 = vpack.i.bf16 %v1483_v21, %v1479_v8  ;;  %1145 = vpow2.f32 %v590_v55 }
 0x13f   : > { %v1136_v24 = vpop.eup %1135  ;;  %v594_v25 = vmul.f32 1.442695, %v566_v63  ;;  %v592_v33 = vmul.f32 1.442695, %v565_v12  ;;  %v552_v28 = vsel %vm520_vm0, %v502_v62, %v536_v46  ;;  %v1490_v37 = vsel %vm249_vm1, %v1444_v40, %v1134_v57 }
 0x140   : > { %v1138_v29 = vpop.eup %1137  ;;  %v568_v35 = vsub.f32 0.0, %v552_v28  ;;  %v551_v2 = vsel %vm519_vm2, %v499_v4, %v535_v16  ;;  %1065 = vrot.lane.b32.xlu0 %v1064_v20, %s1221_s9  ;;  %v1494_v44 = vsel %vm249_vm1, %v1433_v17, %v1136_v24  ;;  %v725_v63 = vlaneseq }
 0x141   : > { %v505_v36 = vpop.xlane.xlu0 %504  ;;  %1147 = vpow2.f32 %v592_v33  ;;  %v567_v45 = vsub.f32 0.0, %v551_v2  ;;  %v1069_v49 = vpack.i.bf16 %v1494_v44, %v1490_v37  ;;  %v1501_v17 = vsel %vm249_vm1, %v1448_v51, %v1138_v29 }
 0x142   : > { %vm521_vm3 = vcmp.gt.f32.partialorder %v505_v36, 0.0  ;;  %v537_v47 = vmul.f32 0.2, %v505_v36  ;;  %1149 = vpow2.f32 %v392_v43  ;;  %v598_v34 = vmul.f32 1.442695, %v568_v35 }
 0x143   : > { %v1140_v50 = vpop.eup %1139  ;;  %1151 = vpow2.f32 %v594_v25  ;;  %v596_v42 = vmul.f32 1.442695, %v567_v45  ;;  %1070 = vrot.lane.b32.xlu1 %v1069_v49, %s1221_s9  ;;  %v726_v57 = vshrl.u32 %v725_v63, 7  ;;  %v730_v20 = vstv %s967_s10 }
 0x144   : > { %v553_v5 = vsel %vm521_vm3, %v505_v36, %v537_v47  ;;  %1153 = vpow2.f32 %v386_v53  ;;  %v1505_v43 = vsel %vm249_vm1, %v1442_v41, %v1140_v50  ;;  %v1142_v54 = vpop.eup %1141  ;;  %v968_v36 = vld [vmem:[%s193_s24] ss:$0 sm:$0xff] }
 0x145   : > { %v569_v40 = vsub.f32 0.0, %v553_v5  ;;  %1155 = vpow2.f32 %v596_v42  ;;  %v1074_v52 = vpack.i.bf16 %v1505_v43, %v1501_v17  ;;  %v1512_v51 = vsel %vm249_vm1, %v1455_v9, %v1142_v54 }
 0x146   : > { %1157 = vpow2.f32 %v598_v34  ;;  %v727_v13 = vadd.s32 8, %v726_v57  ;;  %v728_v24 = vadd.s32 16, %v726_v57  ;;  %v731_v28 = vadd.s32 %v730_v20, %v726_v57 }
 0x147   : > { %v600_v55 = vmul.f32 1.442695, %v569_v40  ;;  %v1144_v56 = vpop.eup %1143  ;;  %1159 = vpow2.f32 %v390_v58  ;;  %1075 = vrot.lane.b32.xlu1 %v1074_v52, %s1221_s9  ;;  %v1222_v58 = vmov 1.0|1.0   ;;  %v618_v40 = vmul.f32 %v1461_v32, %v1306_v3 }
 0x148   : > { %v1516_v41 = vsel %vm249_vm1, %v1446_v48, %v1144_v56  ;;  %v1146_v53 = vpop.eup %1145  ;;  %v732_v29 = vadd.s32 %v730_v20, %v727_v13  ;;  %v733_v45 = vadd.s32 %v730_v20, %v728_v24  ;;  %vm739_vm4 = vcmp.eq.s32.totalorder %v731_v28, %v968_v36 }
 0x149   : > { %1161 = vpow2.f32 %v600_v55  ;;  %v1079_v60 = vpack.i.bf16 %v1516_v41, %v1512_v51  ;;  %v1523_v4 = vsel %vm249_vm1, %v1475_v61, %v1146_v53  ;;  %v729_v61 = vadd.s32 24, %v726_v57 }
 0x14a   : > { %vm740_vm5 = vcmp.eq.s32.totalorder %v732_v29, %v968_v36  ;;  %vm741_vm7 = vcmp.eq.s32.totalorder %v733_v45, %v968_v36  ;;  %v619_v54 = vmul.f32 %v1465_v38, %v1311_v6  ;;  %v625_v24 = vmul.f32 %v1505_v43, %v1334_v15 }
 0x14b   : > { %v1148_v0 = vpop.eup %1147  ;;  %1080 = vrot.lane.b32.xlu0 %v1079_v60, %s1221_s9  ;;  %v734_v34 = vadd.s32 %v730_v20, %v729_v61  ;;  %vm973_vm6 = vmpackc.low %vm740_vm5, %vm739_vm4  ;;  %v624_v20 = vmul.f32 %v1501_v17, %v1331_v14  ;;  %v627_v28 = vmul.f32 %v1516_v41, %v1344_v19 }
 0x14c   : > { %v1150_v62 = vpop.eup %1149  ;;  %v1527_v9 = vsel %vm249_vm1, %v1453_v59, %v1148_v0  ;;  %1010 = vmatprep.mubr.msk.bf16.mxu0 %vm973_vm6, %v1222_v58  ;;  %v620_v0 = vmul.f32 %v1479_v8, %v1300_v1 }
 0x14d   : > { %v1152_v48 = vpop.eup %1151  ;;  %v1084_v12 = vpack.i.bf16 %v1527_v9, %v1523_v4  ;;  %vm742_vm8 = vcmp.eq.s32.totalorder %v734_v34, %v968_v36 }
 0x14e   : > { %v1154_v46 = vpop.eup %1153  ;;  %vm1557_vm9 = vmpackc.low %vm742_vm8, %vm741_vm7 }
 0x14f   : > { %v1156_v16 = vpop.eup %1155  ;;  %1085 = vrot.lane.b32.xlu1 %v1084_v12, %s1221_s9  ;;  %v1534_v33 = vsel %vm249_vm1, %v1154_v46, %v1152_v48  ;;  %v622_v12 = vmul.f32 %v1490_v37, %v1321_v10  ;;  %v623_v46 = vmul.f32 %v1494_v44, %v1324_v11  ;;  %v626_v11 = vmul.f32 %v1512_v51, %v1341_v18 }
 0x150   : > { %v1158_v25 = vpop.eup %1157  ;;  %v1538_v59 = vsel %vm249_vm1, %v1467_v39, %v1156_v16  ;;  %v628_v51 = vmul.f32 %v1523_v4, %v1351_v22 }
 0x151   : > { %v1160_v35 = vpop.eup %1159  ;;  %v1089_v2 = vpack.i.bf16 %v1538_v59, %v1534_v33 }
 0x152   : > { %v1549_v39 = vsel %vm249_vm1, %v1160_v35, %v1158_v25 }
 0x153   : > { %v1162_v47 = vpop.eup %1161  ;;  %1090 = vrot.lane.b32.xlu0 %v1089_v2, %s1221_s9  ;;  %v629_v2 = vmul.f32 %v1527_v9, %v1354_v23  ;;  %v632_v23 = vmul.f32 %v1549_v39, %v1371_v30  ;;  %v755_v30 = vld [vmem:[#allocation2 + $0x10] sm:$0xff] }
 0x154   : > { %v1552_v49 = vsel %vm249_vm1, %v1150_v62, %v1162_v47  ;;  %v621_v62 = vmul.f32 %v1483_v21, %v1314_v7  ;;  %vm810_vm1 = vcmask 261120  }
 0x155   : > { %v1094_v50 = vpack.i.bf16 %v1552_v49, %v1549_v39  ;;  %v753_v39 = vld [vmem:[#allocation2] sm:$0xff] }
 0x157   : > { %1095 = vrot.lane.b32.xlu1 %v1094_v50, %s1221_s9  ;;  %v630_v50 = vmul.f32 %v1534_v33, %v1361_v26 }
 0x1ac   : > { %v1061_v5 = vpop.permute.xlu1 %1060 }
 0x1ad   : > { %v1063_v52 = vunpack.i.h.bf16 %v1061_v5  ;;  %v1062_v55 = vunpack.i.l.bf16 %v1061_v5  ;;  %v631_v5 = vmul.f32 %v1538_v59, %v1364_v27 }
 0x1af   : > { %v699_v56 = vsel %vm698_vm10, %v618_v40, %v1062_v55  ;;  %v700_v53 = vsel %vm698_vm10, %v619_v54, %v1063_v52  ;;  %v633_v52 = vmul.f32 %v1552_v49, %v1374_v31  ;;  %v756_v49 = vld [vmem:[#allocation2 + $0x18] sm:$0xff] }
 0x1b0   : > { %v715_v60 = vpack.c.bf16 %v700_v53, %v699_v56 }
 0x1b2   : > { %v1066_v63 = vpop.permute.xlu0 %1065  ;;  %994 = vmatprep.subr.bf16.mxu0 %v715_v60 }
 0x1b3   : > { %v1068_v57 = vunpack.i.h.bf16 %v1066_v63  ;;  %v1067_v3 = vunpack.i.l.bf16 %v1066_v63  ;;  %995 = vmatpush3.bf16.msra.mxu0 %v715_v60  ;;  %v754_v63 = vld [vmem:[#allocation2 + $0x8] sm:$0xff] }
 0x1b5   : > { %v701_v6 = vsel %vm698_vm10, %v620_v0, %v1067_v3  ;;  %v702_v32 = vsel %vm698_vm10, %v621_v62, %v1068_v57  ;;  %v1071_v38 = vpop.permute.xlu1 %1070 }
 0x1b6   : > { %v716_v48 = vpack.c.bf16 %v702_v32, %v701_v6  ;;  %v1073_v13 = vunpack.i.h.bf16 %v1071_v38  ;;  %v1072_v1 = vunpack.i.l.bf16 %v1071_v38 }
 0x1b8   : > { %996 = vmatprep.subr.bf16.mxu0 %v716_v48  ;;  %v703_v7 = vsel %vm698_vm10, %v622_v12, %v1072_v1  ;;  %v704_v8 = vsel %vm698_vm10, %v623_v46, %v1073_v13 }
 0x1b9   : > { %997 = vmatpush3.bf16.msra.mxu0 %v716_v48  ;;  %v1076_v21 = vpop.permute.xlu1 %1075  ;;  %v717_v16 = vpack.c.bf16 %v704_v8, %v703_v7 }
 0x1ba   : > { %v1078_v10 = vunpack.i.h.bf16 %v1076_v21  ;;  %v1077_v37 = vunpack.i.l.bf16 %v1076_v21 }
 0x1bb   : > { %998 = vmatprep.subr.bf16.mxu0 %v717_v16 }
 0x1bc   : > { %v705_v61 = vsel %vm698_vm10, %v624_v20, %v1077_v37  ;;  %v706_v25 = vsel %vm698_vm10, %v625_v24, %v1078_v10 }
 0x1bd   : > { %999 = vmatpush3.bf16.msra.mxu0 %v717_v16  ;;  %v1081_v44 = vpop.permute.xlu0 %1080  ;;  %v718_v17 = vpack.c.bf16 %v706_v25, %v705_v61 }
 0x1be   : > { %v1083_v29 = vunpack.i.h.bf16 %v1081_v44  ;;  %v1082_v14 = vunpack.i.l.bf16 %v1081_v44 }
 0x1bf   : > { %1000 = vmatprep.subr.bf16.mxu0 %v718_v17 }
 0x1c0   : > { %v707_v15 = vsel %vm698_vm10, %v626_v11, %v1082_v14  ;;  %v708_v43 = vsel %vm698_vm10, %v627_v28, %v1083_v29 }
 0x1c1   : > { %1001 = vmatpush3.bf16.msra.mxu0 %v718_v17  ;;  %v1086_v35 = vpop.permute.xlu1 %1085  ;;  %v719_v18 = vpack.c.bf16 %v708_v43, %v707_v15 }
 0x1c2   : > { %v1088_v36 = vunpack.i.h.bf16 %v1086_v35  ;;  %v1087_v45 = vunpack.i.l.bf16 %v1086_v35 }
 0x1c3   : > { %1002 = vmatprep.subr.bf16.mxu0 %v719_v18 }
 0x1c4   : > { %v709_v19 = vsel %vm698_vm10, %v628_v51, %v1087_v45  ;;  %v710_v41 = vsel %vm698_vm10, %v629_v2, %v1088_v36 }
 0x1c5   : > { %1003 = vmatpush3.bf16.msra.mxu0 %v719_v18  ;;  %v1091_v47 = vpop.permute.xlu0 %1090  ;;  %v720_v34 = vpack.c.bf16 %v710_v41, %v709_v19 }
 0x1c6   : > { %v1093_v22 = vunpack.i.h.bf16 %v1091_v47  ;;  %v1092_v4 = vunpack.i.l.bf16 %v1091_v47 }
 0x1c7   : > { %1004 = vmatprep.subr.bf16.mxu0 %v720_v34 }
 0x1c8   : > { %v711_v40 = vsel %vm698_vm10, %v630_v50, %v1092_v4  ;;  %v712_v54 = vsel %vm698_vm10, %v631_v5, %v1093_v22 }
 0x1c9   : > { %v1096_v9 = vpop.permute.xlu1 %1095  ;;  %1005 = vmatpush3.bf16.msra.mxu0 %v720_v34  ;;  %v721_v33 = vpack.c.bf16 %v712_v54, %v711_v40 }
 0x1ca   : > { %v1098_v55 = vunpack.i.h.bf16 %v1096_v9  ;;  %v1097_v26 = vunpack.i.l.bf16 %v1096_v9 }
 0x1cb   : > { %1006 = vmatprep.subr.bf16.mxu0 %v721_v33 }
 0x1cc   : > { %v713_v27 = vsel %vm698_vm10, %v632_v23, %v1097_v26  ;;  %v714_v59 = vsel %vm698_vm10, %v633_v52, %v1098_v55 }
 0x1cd   : > { %v722_v56 = vpack.c.bf16 %v714_v59, %v713_v27  ;;  %1007 = vmatpush3.bf16.msra.mxu0 %v721_v33 }
 0x1cf   : > { %1008 = vmatprep.subr.bf16.mxu0 %v722_v56 }
 0x1d1   : > { %1009 = vmatpush3.bf16.msra.mxu0 %v722_v56 }
 0x1d4   : > { %1011 = vmatmul.mubr.msk.bf16.vlgmr.msra.gmra.mrb[0].mxu0 %vm1557_vm9, %v1222_v58 }
 0x2a7   : > { %v1012_v31 = vpop.f32.mrb[0].mxu0  ;;  %818 = sbr.rel (%p977_p9) target bundleno = 842 (0x34a), region = 40 }
 0x2a8   : > { %v808_v53 = vadd.f32 %v1012_v31, %v755_v30  ;;  %v791_v60 = vpop.f32.mrb[1].mxu0 }
 0x2a9   : > { %v806_v0 = vadd.f32 %v791_v60, %v753_v39  ;;  %v1013_v62 = vpop.f32.mrb[2].mxu0 }
 0x2aa   : > { %813 = vst.msk [vmem:[#allocation2 + $0x10] sm:$0xff] %vm810_vm1, %v808_v53  ;;  %v809_v57 = vadd.f32 %v1013_v62, %v756_v49  ;;  %v794_v3 = vpop.f32.mrb[3].mxu0 }
 0x2ab   : > { %811 = vst.msk [vmem:[#allocation2] sm:$0xff] %vm810_vm1, %v806_v0  ;;  %v807_v6 = vadd.f32 %v794_v3, %v754_v63 }
 0x2ac   : > { %814 = vst.msk [vmem:[#allocation2 + $0x18] sm:$0xff] %vm810_vm1, %v809_v57 }
 0x2ad   : > { %812 = vst.msk [vmem:[#allocation2 + $0x8] sm:$0xff] %vm810_vm1, %v807_v6 }
 0x2b1   : > { %v821_v58 = vld [vmem:[#allocation2 + $0x10] sm:$0xff] }
 0x2b2   : > { %v819_v42 = vld [vmem:[#allocation2] sm:$0xff]  ;;  %vm825_vm11 = vcmp.eq.f32.partialorder %v821_v58, 0.0 }
 0x2b3   : > { %v822_v32 = vld [vmem:[#allocation2 + $0x18] sm:$0xff]  ;;  %vm823_vm12 = vcmp.eq.f32.partialorder %v819_v42, 0.0  ;;  %v829_v48 = vsel %vm825_vm11, 1e-12, %v821_v58 }
 0x2b4   : > { %vm826_vm13 = vcmp.eq.f32.partialorder %v822_v32, 0.0  ;;  %v820_v38 = vld [vmem:[#allocation2 + $0x8] sm:$0xff]  ;;  %v827_v12 = vsel %vm823_vm12, 1e-12, %v819_v42  ;;  %839 = vrot.lane.b32.xlu1 %v829_v48, %s1223_s19 }
 0x2b5   : > { %835 = vrot.lane.b32.xlu0 %v827_v12, %s1223_s19  ;;  %vm824_vm14 = vcmp.eq.f32.partialorder %v820_v38, 0.0  ;;  %v830_v46 = vsel %vm826_vm13, 1e-12, %v822_v32 }
 0x2b6   : > { %v828_v13 = vsel %vm824_vm14, 1e-12, %v820_v38 }
 0x2b8   : > { %841 = vrot.lane.b32.xlu1 %v830_v46, %s1223_s19 }
 0x2b9   : > { %837 = vrot.lane.b32.xlu0 %v828_v13, %s1223_s19 }
 0x326   : > { %v840_v1 = vpop.permute.xlu1 %839 }
 0x327   : > { %v836_v7 = vpop.permute.xlu0 %835  ;;  %1163 = vrcp.f32 %v840_v1 }
 0x328   : > { %1165 = vrcp.f32 %v836_v7 }
 0x32a   : > { %v842_v8 = vpop.permute.xlu1 %841 }
 0x32b   : > { %v838_v21 = vpop.permute.xlu0 %837  ;;  %1167 = vrcp.f32 %v842_v8 }
 0x32c   : > { %1169 = vrcp.f32 %v838_v21 }
 0x331   : > { %v1164_v16 = vpop.eup %1163 }
 0x332   : > { %v1166_v20 = vpop.eup %1165  ;;  %v852_v24 = vmul.f32 %v1164_v16, %v821_v58 }
 0x333   : > { %v848_v10 = vmul.f32 %v1166_v20, %v819_v42 }
 0x334   : > { %v863_v37 = vmul.f32 1.442695, %v852_v24  ;;  %vm857_vm2 = vcmp.gt.f32.partialorder %v852_v24, 0.0 }
 0x335   : > { %v1168_v11 = vpop.eup %1167  ;;  %v859_v44 = vmul.f32 1.442695, %v848_v10  ;;  %vm855_vm15 = vcmp.gt.f32.partialorder %v848_v10, 0.0 }
 0x336   : > { %v1170_v61 = vpop.eup %1169  ;;  %v854_v25 = vmul.f32 %v1168_v11, %v822_v32 }
 0x337   : > { %1171 = vpow2.f32 %v859_v44  ;;  %v850_v28 = vmul.f32 %v1170_v61, %v820_v38 }
 0x338   : > { %1173 = vpow2.f32 %v863_v37  ;;  %v865_v29 = vmul.f32 1.442695, %v854_v25  ;;  %vm858_vm3 = vcmp.gt.f32.partialorder %v854_v25, 0.0 }
 0x339   : > { %v861_v14 = vmul.f32 1.442695, %v850_v28  ;;  %vm856_vm0 = vcmp.gt.f32.partialorder %v850_v28, 0.0 }
 0x33a   : > { %1175 = vpow2.f32 %v865_v29 }
 0x33b   : > { %1177 = vpow2.f32 %v861_v14 }
 0x341   : > { %v1172_v17 = vpop.eup %1171 }
 0x342   : > { %v1174_v15 = vpop.eup %1173  ;;  %v978_v43 = vadd.f32 -1.0, %v1172_v17 }
 0x343   : > { %v980_v2 = vadd.f32 -1.0, %v1174_v15 }
 0x344   : > { %v1176_v35 = vpop.eup %1175  ;;  %v871_v18 = vsel %vm855_vm15, %v848_v10, %v978_v43 }
 0x345   : > { %v1178_v51 = vpop.eup %1177  ;;  %875 = vst.msk [vmem:[%s1296_s5] sm:$0xff] %vm698_vm10, %v871_v18  ;;  %v981_v36 = vadd.f32 -1.0, %v1176_v35  ;;  %v873_v41 = vsel %vm857_vm2, %v852_v24, %v980_v2 }
 0x346   : > { %v979_v45 = vadd.f32 -1.0, %v1178_v51  ;;  %877 = vst.msk [vmem:[%s1296_s5 + $0x10] sm:$0xff] %vm698_vm10, %v873_v41 }
 0x347   : > { %v874_v47 = vsel %vm858_vm3, %v854_v25, %v981_v36 }
 0x348   : > { %v872_v19 = vsel %vm856_vm0, %v850_v28, %v979_v45  ;;  %878 = vst.msk [vmem:[%s1296_s5 + $0x18] sm:$0xff] %vm698_vm10, %v874_v47 }
 0x349   : > { %876 = vst.msk [vmem:[%s1296_s5 + $0x8] sm:$0xff] %vm698_vm10, %v872_v19 }
 0x34a PF: > { %s13_s16 = sadd.s32 1, %s1217_s16   ;;  %s1643_s12 = smov %s1209_s14 }
 0x34b   : > { %p10_p10 = scmp.ge.s32.totalorder %s13_s16, 8   ;;  %s1644_s13 = smov %s1213_s15 }
 0x34c   : > { %s1645_s14 = smov %s1648_s17  ;;  %s1646_s15 = smov %s1652_s18 }
 0x34d   :  { %12 = sbr.rel (!%p10_p10) target bundleno = 3 (0x3), region = 73 }

</bundles_post_ra>
